<compile_context>
chip_gen: v6e
topology: v6e:2x2x1
jax: 0.10.0
libtpu: 0.0.40
codegen_flags: <defaults>
</compile_context>

<pallas_src>
import jax
import jax.numpy as jnp
from jax import lax
from jax.experimental import pallas as pl
from jax.experimental.pallas import tpu as pltpu


def _round_up(x, m):
    return (x + m - 1) // m * m


def _pick_tile_h(H, W, Cp, Op, itemsize, budget_bytes=20 * 1024 * 1024):
    """Largest divisor of H whose double-buffered working set fits the budget."""
    best = 1
    for th in range(1, H + 1):
        if H % th:
            continue
        in_blk = 2 * (th + 2) * (W + 2) * Cp * itemsize      # input, double-buffered
        out_blk = 2 * th * W * Op * 4                        # output f32, double-buffered
        work = th * W * (6 * Cp * itemsize + Op * 4)         # im2col patch + f32 acc
        if in_blk + out_blk + work <= budget_bytes:
            best = th
    return best


def acblock_kernel(x_ref, w_ref, b_ref, out_ref):
    # x_ref  : (1, TH+2, W+2, Cp)   zero-padded, channel-padded input window
    # w_ref  : (6*Cp, Op)           fused taps [v0,v1,v2,h0,h1,h2], BN-scaled
    # b_ref  : (1, Op)              combined BN shift (bv + bh), f32
    # out_ref: (1, TH, W, Op)
    TH = out_ref.shape[1]
    W = out_ref.shape[2]
    Op = out_ref.shape[3]
    Cp = x_ref.shape[3]

    x = x_ref[0]  # (TH+2, W+2, Cp)

    # Build the im2col patch ONCE (lane-aligned concat: each piece is Cp=128k
    # lanes wide), then a single big-K matmul on the MXU.
    cols = [x[k:k + TH, 1:1 + W, :] for k in range(3)]        # vertical 3x1 taps
    cols += [x[1:1 + TH, k:k + W, :] for k in range(3)]       # horizontal 1x3 taps
    patch = jnp.concatenate(cols, axis=-1).reshape(TH * W, 6 * Cp)

    acc = jnp.dot(patch, w_ref[...], preferred_element_type=jnp.float32)
    y = acc + b_ref[...]                                      # single f32 bias add
    out_ref[...] = y.reshape(1, TH, W, Op).astype(out_ref.dtype)


def acblock_forward(x_nchw, wv, wh,
                    gamma_v, beta_v, mean_v, var_v,
                    gamma_h, beta_h, mean_h, var_h, eps=1e-5,
                    *, tile_h=None, compute_dtype=jnp.float32):
    """x_nchw: (N,C,H,W); wv: (O,C,3,1); wh: (O,C,1,3). Returns (N,O,H,W) f32."""
    N, C, H, W = x_nchw.shape
    O = wv.shape[0]
    LANE = 128
    Cp = _round_up(C, LANE)
    Op = _round_up(O, LANE)

    in_itemsize = jnp.dtype(compute_dtype).itemsize
    if tile_h is None:
        tile_h = _pick_tile_h(H, W, Cp, Op, in_itemsize)
    tile_h = max(1, min(int(tile_h), H))
    while H % tile_h:
        tile_h -= 1
    TH = tile_h
    Ht = H // TH

    # ---- Fold eval-mode BN into the conv weights; single combined bias. ----
    inv_v = (gamma_v / jnp.sqrt(var_v + eps)).astype(jnp.float32)
    inv_h = (gamma_h / jnp.sqrt(var_h + eps)).astype(jnp.float32)
    bias = (beta_v - mean_v * inv_v) + (beta_h - mean_h * inv_h)
    bias = jnp.pad(bias.astype(jnp.float32), (0, Op - O)).reshape(1, Op)

    wv_k = jnp.transpose(wv[:, :, :, 0], (2, 1, 0)).astype(jnp.float32)  # (3,C,O)
    wh_k = jnp.transpose(wh[:, :, 0, :], (2, 1, 0)).astype(jnp.float32)  # (3,C,O)
    wv_k = wv_k * inv_v[None, None, :]
    wh_k = wh_k * inv_h[None, None, :]
    w_all = jnp.concatenate([wv_k, wh_k], axis=0)                        # (6,C,O)
    w_all = jnp.pad(w_all, ((0, 0), (0, Cp - C), (0, Op - O)))           # (6,Cp,Op)
    w_fused = w_all.reshape(6 * Cp, Op).astype(compute_dtype)

    # ---- Single wrapper pass: NCHW->NHWC, zero halo pad, channel pad, and ----
    # ---- gather of overlapping (TH+2)-row windows (all fused by XLA).     ----
    x = jnp.transpose(x_nchw, (0, 2, 3, 1))                              # (N,H,W,C)
    x = jnp.pad(x, ((0, 0), (1, 1), (1, 1), (0, Cp - C)))                # (N,H+2,W+2,Cp)
    row_idx = (jnp.arange(Ht) * TH)[:, None] + jnp.arange(TH + 2)[None, :]
    x_tiles = x[:, row_idx].reshape(N * Ht, TH + 2, W + 2, Cp).astype(compute_dtype)

    out_tiles = pl.pallas_call(
        acblock_kernel,
        out_shape=jax.ShapeDtypeStruct((N * Ht, TH, W, Op), jnp.float32),
        grid_spec=pltpu.PrefetchScalarGridSpec(
            num_scalar_prefetch=0,
            grid=(N * Ht,),
            in_specs=[
                pl.BlockSpec((1, TH + 2, W + 2, Cp), lambda t: (t, 0, 0, 0)),
                pl.BlockSpec((6 * Cp, Op), lambda t: (0, 0)),
                pl.BlockSpec((1, Op), lambda t: (0, 0)),
            ],
            out_specs=pl.BlockSpec((1, TH, W, Op), lambda t: (t, 0, 0, 0)),
        ),
        compiler_params=pltpu.CompilerParams(
            dimension_semantics=("parallel",),
            vmem_limit_bytes=48 * 1024 * 1024),
    )(x_tiles, w_fused, bias)

    out = out_tiles.reshape(N, H, W, Op)[:, :, :, :O]
    return jnp.transpose(out, (0, 3, 1, 2))  # back to NCHW


def acblock_reference(x, wv, wh,
                      gamma_v, beta_v, mean_v, var_v,
                      gamma_h, beta_h, mean_h, var_h, eps=1e-5):
    """Plain-JAX reference (NCHW conv + eval-mode BN) used for verification."""
    dn = lax.conv_dimension_numbers(x.shape, wv.shape, ('NCHW', 'OIHW', 'NCHW'))
    yv = lax.conv_general_dilated(x, wv, (1, 1), ((1, 1), (0, 0)),
                                  dimension_numbers=dn)
    yh = lax.conv_general_dilated(x, wh, (1, 1), ((0, 0), (1, 1)),
                                  dimension_numbers=dn)

    def bn(y, g, b, m, v):
        g = g[None, :, None, None]
        b = b[None, :, None, None]
        m = m[None, :, None, None]
        v = v[None, :, None, None]
        return (y - m) / jnp.sqrt(v + eps) * g + b

    return bn(yv, gamma_v, beta_v, mean_v, var_v) + \
           bn(yh, gamma_h, beta_h, mean_h, var_h)


if __name__ == "__main__":
    N, C, O, H, W = 2, 4, 8, 16, 16

    key = jax.random.PRNGKey(0)
    kx, kwv, kwh = jax.random.split(key, 3)
    x = jax.random.normal(kx, (N, C, H, W), dtype=jnp.float32)
    wv = jax.random.normal(kwv, (O, C, 3, 1), dtype=jnp.float32) * 0.1
    wh = jax.random.normal(kwh, (O, C, 1, 3), dtype=jnp.float32) * 0.1

    # Deterministic, non-trivial BatchNorm parameters (eval mode).
    gamma_v = 1.0 + 0.1 * jnp.arange(O, dtype=jnp.float32)
    beta_v = 0.05 * jnp.arange(O, dtype=jnp.float32)
    mean_v = 0.02 * jnp.arange(O, dtype=jnp.float32)
    var_v = 1.0 + 0.05 * jnp.arange(O, dtype=jnp.float32)
    gamma_h = 0.9 - 0.05 * jnp.arange(O, dtype=jnp.float32)
    beta_h = -0.03 * jnp.arange(O, dtype=jnp.float32)
    mean_h = -0.01 * jnp.arange(O, dtype=jnp.float32)
    var_h = 1.5 + 0.02 * jnp.arange(O, dtype=jnp.float32)

    ref = acblock_reference(x, wv, wh,
                            gamma_v, beta_v, mean_v, var_v,
                            gamma_h, beta_h, mean_h, var_h)

    # f32 compute, explicit H-tiling (exercises halo handling across tiles).
    out = acblock_forward(x, wv, wh,
                          gamma_v, beta_v, mean_v, var_v,
                          gamma_h, beta_h, mean_h, var_h,
                          tile_h=8, compute_dtype=jnp.float32)
    out = jax.block_until_ready(out)
    assert out.shape == (N, O, H, W)
    assert jnp.allclose(out, ref, atol=1e-4, rtol=1e-4), \
        f"f32 max abs err {jnp.max(jnp.abs(out - ref))}"

    # bf16 MXU path (v6e/v7x throughput mode), auto tile size, f32 accumulation.
    out_bf16 = acblock_forward(x, wv, wh,
                               gamma_v, beta_v, mean_v, var_v,
                               gamma_h, beta_h, mean_h, var_h,
                               compute_dtype=jnp.bfloat16)
    out_bf16 = jax.block_until_ready(out_bf16)
    assert out_bf16.shape == (N, O, H, W)
    assert jnp.allclose(out_bf16, ref, atol=1e-1, rtol=1e-1), \
        f"bf16 max abs err {jnp.max(jnp.abs(out_bf16 - ref))}"

    print("KERNEL_OK")
</pallas_src>

<mosaic_0001>
module attributes {stable_mosaic.version = 11 : i64} {
  func.func @acblock_kernel(%arg0: i32, %arg1: memref<1x10x18x128xf32, #tpu.memory_space<vmem>>, %arg2: memref<768x128xf32, #tpu.memory_space<vmem>>, %arg3: memref<1x128xf32, #tpu.memory_space<vmem>>, %arg4: memref<1x8x16x128xf32, #tpu.memory_space<vmem>>) attributes {dimension_semantics = [#tpu.dimension_semantics<parallel>], iteration_bounds = array<i64: 4>, scalar_prefetch = 0 : i64, scratch_operands = 0 : i64, tpu.core_type = #tpu.core_type<tc>, window_params = [{transform_indices = @transform_0, window_bounds = array<i64: 1, 10, 18, 128>}, {pipeline_mode = #tpu.pipeline_mode<synchronous>, transform_indices = @transform_1, window_bounds = array<i64: 768, 128>}, {pipeline_mode = #tpu.pipeline_mode<synchronous>, transform_indices = @transform_2, window_bounds = array<i64: 1, 128>}, {transform_indices = @transform_3, window_bounds = array<i64: 1, 8, 16, 128>}]} {
    %c0 = arith.constant 0 : index
    %c0_0 = arith.constant 0 : index
    %c0_1 = arith.constant 0 : index
    %c0_2 = arith.constant 0 : index
    %0 = vector.load %arg1[%c0, %c0_0, %c0_1, %c0_2] : memref<1x10x18x128xf32, #tpu.memory_space<vmem>>, vector<1x10x18x128xf32>
    %1 = vector.shape_cast %0 : vector<1x10x18x128xf32> to vector<10x18x128xf32>
    %2 = vector.extract_strided_slice %1 {offsets = [0, 1, 0], sizes = [8, 16, 128], strides = [1, 1, 1]} : vector<10x18x128xf32> to vector<8x16x128xf32>
    %3 = vector.extract_strided_slice %1 {offsets = [1, 1, 0], sizes = [8, 16, 128], strides = [1, 1, 1]} : vector<10x18x128xf32> to vector<8x16x128xf32>
    %4 = vector.extract_strided_slice %1 {offsets = [2, 1, 0], sizes = [8, 16, 128], strides = [1, 1, 1]} : vector<10x18x128xf32> to vector<8x16x128xf32>
    %5 = vector.extract_strided_slice %1 {offsets = [1, 0, 0], sizes = [8, 16, 128], strides = [1, 1, 1]} : vector<10x18x128xf32> to vector<8x16x128xf32>
    %6 = vector.extract_strided_slice %1 {offsets = [1, 1, 0], sizes = [8, 16, 128], strides = [1, 1, 1]} : vector<10x18x128xf32> to vector<8x16x128xf32>
    %7 = vector.extract_strided_slice %1 {offsets = [1, 2, 0], sizes = [8, 16, 128], strides = [1, 1, 1]} : vector<10x18x128xf32> to vector<8x16x128xf32>
    %8 = tpu.concatenate %2, %3, %4, %5, %6, %7 in 2 : vector<8x16x128xf32>, vector<8x16x128xf32>, vector<8x16x128xf32>, vector<8x16x128xf32>, vector<8x16x128xf32>, vector<8x16x128xf32> -> vector<8x16x768xf32>
    %9 = vector.shape_cast %8 : vector<8x16x768xf32> to vector<128x768xf32>
    %c0_3 = arith.constant 0 : index
    %c0_4 = arith.constant 0 : index
    %10 = vector.load %arg2[%c0_3, %c0_4] : memref<768x128xf32, #tpu.memory_space<vmem>>, vector<768x128xf32>
    %cst = arith.constant dense<0.000000e+00> : vector<128x128xf32>
    %11 = tpu.matmul %9, %10, %cst {dimension_numbers = #tpu.dot_dimension_numbers<[1], [0], [0], [1], [0, 0, 1, 1], [], []>} : vector<128x768xf32>, vector<768x128xf32>, vector<128x128xf32> -> vector<128x128xf32>
    %c0_5 = arith.constant 0 : index
    %c0_6 = arith.constant 0 : index
    %12 = vector.load %arg3[%c0_5, %c0_6] : memref<1x128xf32, #tpu.memory_space<vmem>>, vector<1x128xf32>
    %13 = vector.broadcast %12 : vector<1x128xf32> to vector<128x128xf32>
    %14 = arith.addf %11, %13 : vector<128x128xf32>
    %15 = vector.shape_cast %14 : vector<128x128xf32> to vector<1x8x16x128xf32>
    %c0_7 = arith.constant 0 : index
    %c0_8 = arith.constant 0 : index
    %c0_9 = arith.constant 0 : index
    %c0_10 = arith.constant 0 : index
    %16 = vector.load %arg4[%c0_7, %c0_8, %c0_9, %c0_10] : memref<1x8x16x128xf32, #tpu.memory_space<vmem>>, vector<1x8x16x128xf32>
    tpu.vector_store %arg4[%c0_7, %c0_8, %c0_9, %c0_10], %15 {strides = array<i32>} : memref<1x8x16x128xf32, #tpu.memory_space<vmem>>, vector<1x8x16x128xf32>,
    return
  }
  func.func @transform_0(%arg0: i32) -> (i32, i32, i32, i32) {
    %c0_i32 = arith.constant 0 : i32
    %c0_i32_0 = arith.constant 0 : i32
    %c0_i32_1 = arith.constant 0 : i32
    %c0_i32_2 = arith.constant 0 : i32
    return %arg0, %c0_i32, %c0_i32_0, %c0_i32_1 : i32, i32, i32, i32
  }
  func.func @transform_1(%arg0: i32) -> (i32, i32) {
    %c0_i32 = arith.constant 0 : i32
    %c0_i32_0 = arith.constant 0 : i32
    %c0_i32_1 = arith.constant 0 : i32
    return %c0_i32, %c0_i32_0 : i32, i32
  }
  func.func @transform_2(%arg0: i32) -> (i32, i32) {
    %c0_i32 = arith.constant 0 : i32
    %c0_i32_0 = arith.constant 0 : i32
    %c0_i32_1 = arith.constant 0 : i32
    return %c0_i32, %c0_i32_0 : i32, i32
  }
  func.func @transform_3(%arg0: i32) -> (i32, i32, i32, i32) {
    %c0_i32 = arith.constant 0 : i32
    %c0_i32_0 = arith.constant 0 : i32
    %c0_i32_1 = arith.constant 0 : i32
    %c0_i32_2 = arith.constant 0 : i32
    return %arg0, %c0_i32, %c0_i32_0, %c0_i32_1 : i32, i32, i32, i32
  }
}

</mosaic_0001>

<bundles_post_ra>
// kernel: tpu_custom_call.1
= control target key start
LH: loop header
LB: loop body
LE: loop exit
PB: predicated region body
PF: predicated region fallthrough
CT: control target
= control target key end

     0   :  { %8 = vsyncpa [#allocation3], 0  ;;  %s2379_s0 = inlined_call_operand.vmem [shape: f32[4,10,18,128], index: 0, kind: input, shape index: {}]   ;;  %s2380_s1 = inlined_call_operand.vmem [shape: f32[768,128], index: 1, kind: input, shape index: {}]   ;;  %s2381_s2 = inlined_call_operand.vmem [shape: f32[1,128], index: 2, kind: input, shape index: {}]   ;;  %s2382_s3 = inlined_call_operand.hbm [shape: f32[4,8,16,128], index: 3, kind: output, shape index: {}]  }
   0x1   :  { %10 = vsyncpa [#allocation3 + $0x1], 0  ;;  %s1479_s12 = smov 0   ;;  %s1481_s13 = smov 0  }
   0x2   :  { %s1483_s14 = smov 0   ;;  %s1485_s15 = smov 0  }
   0x3 LB: > { %s1500_s16 = sadd.s32 4294967295, %s1454_s15   ;;  %s1067_s17 = sadd.s32 4294967294, %s1454_s15   ;;  %s1454_s15 = sphi %s1485_s15, %s2392_s15   ;;  %s1450_s14 = sphi %s1483_s14, %s2391_s14   ;;  %s1446_s13 = sphi %s1481_s13, %s2390_s13   ;;  %s1442_s12 = sphi %s1479_s12, %s2389_s12  }
   0x4   : > { %s1504_s18 = sadd.s32 1, %s1454_s15   ;;  %s91_s19 = sadd.s32 1, %s1450_s14 }
   0x5   : > { %s88_s20 = ssub.s32 %s1454_s15, %s1504_s18  ;;  %p101_p0 = scmp.ne.s32.totalorder %s1450_s14, %s1446_s13 }
   0x6   : > { %p89_p1 = scmp.eq.s32.totalorder %s88_s20, 0  ;;  %p102_p2 = scmp.eq.s32.totalorder %s1500_s16, 3 }
   0x7   : > { %p107_p3 = scmp.ne.s32.totalorder %s1446_s13, %s1442_s12  ;;  %p108_p4 = scmp.eq.s32.totalorder %s1067_s17, 3 }
   0x8   : > { %s1515_s21 = scalar_select %p89_p1, %s1450_s14, %s91_s19  }
   0x9   : > { %p1517_p5 = por %p102_p2, %p101_p0  ;;  %p1521_p6 = por %p108_p4, %p107_p3 }
   0xa   : > { %p1070_p7 = scmp.ge.s32.totalorder %s1454_s15, 1  ;;  %p140_p8 = scmp.lt.s32.totalorder %s1454_s15, 5 }
   0xc   : > { %p141_p9 = pnand %p1070_p7, %p140_p8 }
   0xd   : > { %p164_p10 = scmp.lt.s32.totalorder (!%p141_p9), %s1500_s16, 3  ;;  %s161_s29 = sand.u32 (!%p141_p9), 1, %s1446_s13  }
   0xe   : > { %144 = sbr.rel (%p141_p9) target bundleno = 375 (0x177), region = 32  ;;  %s1071_s4 = sshll.u32 (!%p141_p9), %s161_s29, 7 }
   0xf   : > { %s2276_s5 = scalar_lea.vmem (!%p141_p9), [#allocation2], %s1071_s4  ;;  %s1079_s6 = sshll.u32 (!%p141_p9), %s1500_s16, 11 }
  0x10   : > { %s1005_s7 = sshll.u32 (!%p141_p9), %s2276_s5, 4  ;;  %s1456_s11 = smov (!%p141_p9), [#allocation2]   ;;  %s2334_s7 = int_to_ptr.vmem [resolvable:$true] %s1005_s7 }
  0x11   : > { %s1398_s17 = sshll.u32 (!%p141_p9), %s1456_s11, 4  ;;  %s1399_s17 = int_to_ptr.vmem [resolvable:$false] %s1398_s17 }
  0x12   : > { %s1400_s19 = scalar_lea.vmem (!%p141_p9), %s1399_s17, 4096  ;;  %p1401_p0 = scmp.lt.s32.totalorder (!%p141_p9), %s2334_s7, %s1399_s17 }
  0x13   : > { %v468_v0 = vld [vmem:[%s2380_s1 + $0xf8] sm:$0xff]  ;;  %v467_v2 = vld [vmem:[%s2380_s1 + $0xf0] sm:$0xff]  ;;  %v466_v4 = vld [vmem:[%s2380_s1 + $0xe8] sm:$0xff]  ;;  %s165_s28 = scalar_select %p164_p10, %s1500_s16, 3  ;;  %vm215_vm0 = vcmask 1040384   ;;  %vm248_vm1 = vcmask 1046528  }
  0x14   : > { %v452_v1 = vld [vmem:[%s2380_s1 + $0x78] sm:$0xff]  ;;  %1320 = vmatprep.subr.mxu1 %v468_v0  ;;  %1080 = vmatprep.subr.mxu0 %v468_v0  ;;  %v451_v3 = vld [vmem:[%s2380_s1 + $0x70] sm:$0xff]  ;;  %v450_v5 = vld [vmem:[%s2380_s1 + $0x68] sm:$0xff]  ;;  %s1394_s16 = scalar_lea.vmem %s2334_s7, 2048 }
  0x15   : > { %1336 = vmatpush3.msra.mxu1 %v452_v1  ;;  %1081 = vmatpush3.msra.mxu0 %v452_v1  ;;  %v465_v6 = vld [vmem:[%s2380_s1 + $0xe0] sm:$0xff]  ;;  %v464_v8 = vld [vmem:[%s2380_s1 + $0xd8] sm:$0xff]  ;;  %v463_v10 = vld [vmem:[%s2380_s1 + $0xd0] sm:$0xff]  ;;  %s1352_s10 = smul.u32 240, %s165_s28  ;;  %p1395_p11 = scmp.ne.s32.totalorder %s2334_s7, %s1394_s16 }
  0x16   : > { %1321 = vmatprep.subr.mxu1 %v467_v2  ;;  %1082 = vmatprep.subr.mxu0 %v467_v2  ;;  %v449_v7 = vld [vmem:[%s2380_s1 + $0x60] sm:$0xff]  ;;  %v448_v9 = vld [vmem:[%s2380_s1 + $0x58] sm:$0xff]  ;;  %v447_v11 = vld [vmem:[%s2380_s1 + $0x50] sm:$0xff]  ;;  %p1402_p1 = scmp.lt.s32.totalorder %s1400_s19, %s1394_s16 }
  0x17   : > { %1337 = vmatpush3.msra.mxu1 %v451_v3  ;;  %1083 = vmatpush3.msra.mxu0 %v451_v3  ;;  %v462_v12 = vld [vmem:[%s2380_s1 + $0xc8] sm:$0xff]  ;;  %v461_v14 = vld [vmem:[%s2380_s1 + $0xc0] sm:$0xff]  ;;  %v460_v16 = vld [vmem:[%s2380_s1 + $0xb8] sm:$0xff]  ;;  %s1589_s30 = scalar_lea.vmem %s2379_s0, %s1352_s10  ;;  %s2332_s10 = scalar_lea.hbm %s2382_s3, %s1079_s6 }
  0x18   : > { %1322 = vmatprep.subr.mxu1 %v466_v4  ;;  %1084 = vmatprep.subr.mxu0 %v466_v4  ;;  %v446_v13 = vld [vmem:[%s2380_s1 + $0x48] sm:$0xff]  ;;  %v445_v15 = vld [vmem:[%s2380_s1 + $0x40] sm:$0xff]  ;;  %v444_v17 = vld [vmem:[%s2380_s1 + $0x38] sm:$0xff]  ;;  %p1396_p12 = pnand %p1395_p11, %p1517_p5  ;;  %p1403_p2 = por %p1402_p1, %p1401_p0 }
  0x19   : > { %1338 = vmatpush3.msra.mxu1 %v450_v5  ;;  %1085 = vmatpush3.msra.mxu0 %v450_v5  ;;  %v459_v18 = vld [vmem:[%s2380_s1 + $0xb0] sm:$0xff]  ;;  %v458_v20 = vld [vmem:[%s2380_s1 + $0xa8] sm:$0xff]  ;;  %v1601_v22 = vld [vmem:[%s1589_s30 + $0x60] sm:$0xff] }
  0x1a   : > { %1323 = vmatprep.subr.mxu1 %v465_v6  ;;  %1086 = vmatprep.subr.mxu0 %v465_v6  ;;  %v443_v19 = vld [vmem:[%s2380_s1 + $0x30] sm:$0xff]  ;;  %v442_v21 = vld [vmem:[%s2380_s1 + $0x28] sm:$0xff]  ;;  %v457_v23 = vld [vmem:[%s2380_s1 + $0xa0] sm:$0xff]  ;;  %v225_v24 = vrot.slane %v1601_v22, 7  ;;  %v264_v49 = vrot.slane %v1601_v22, 1  ;;  %p1397_p13 = pneg %p1396_p12 }
  0x1b   : > { %1339 = vmatpush3.msra.mxu1 %v449_v7  ;;  %1087 = vmatpush3.msra.mxu0 %v449_v7  ;;  %v441_v25 = vld [vmem:[%s2380_s1 + $0x20] sm:$0xff]  ;;  %v456_v26 = vld [vmem:[%s2380_s1 + $0x98] sm:$0xff]  ;;  %v1614_v27 = vld [vmem:[%s1589_s30 + $0x68] sm:$0xff] }
  0x1c   : > { %1324 = vmatprep.subr.mxu1 %v464_v8  ;;  %1088 = vmatprep.subr.mxu0 %v464_v8  ;;  %v440_v28 = vld [vmem:[%s2380_s1 + $0x18] sm:$0xff]  ;;  %v1623_v30 = vld [vmem:[%s1589_s30 + $0x80] sm:$0xff]  ;;  %v226_v31 = vrot.slane %v1614_v27, 7  ;;  %v455_v32 = vld [vmem:[%s2380_s1 + $0x90] sm:$0xff]  ;;  %v330_v38 = vrot.slane %v225_v24, 1  ;;  %v265_v50 = vrot.slane %v1614_v27, 1  ;;  %p1404_p3 = pnand %p1403_p2, %p1397_p13 }
  0x1d   : > { %1340 = vmatpush3.msra.mxu1 %v448_v9  ;;  %1089 = vmatpush3.msra.mxu0 %v448_v9  ;;  %v1620_v29 = vld [vmem:[%s1589_s30 + $0x78] sm:$0xff]  ;;  %v1633_v34 = vld [vmem:[%s1589_s30 + $0x20] sm:$0xff]  ;;  %v439_v35 = vld [vmem:[%s2380_s1 + $0x10] sm:$0xff]  ;;  %v270_v40 = vrot.slane %v1623_v30, 1 }
  0x1e   : > { %1325 = vmatprep.subr.mxu1 %v463_v10  ;;  %1090 = vmatprep.subr.mxu0 %v463_v10  ;;  %v1630_v33 = vld [vmem:[%s1589_s30 + $0x18] sm:$0xff]  ;;  %v169_v36 = vld [vmem:[%s1589_s30] sm:$0xff]  ;;  %v1640_v37 = vld [vmem:[%s1589_s30 + $0x8] sm:$0xff]  ;;  %v269_v39 = vrot.slane %v1620_v29, 1  ;;  %v1651_v43 = vsel %vm215_vm0, %v225_v24, %v226_v31  ;;  %v250_v46 = vrot.slane %v1633_v34, 1  ;;  %v1702_v2 = vsel %vm248_vm1, %v264_v49, %v265_v50 }
  0x1f   : > { %1341 = vmatpush3.msra.mxu1 %v447_v11  ;;  %1091 = vmatpush3.msra.mxu0 %v447_v11  ;;  %v1645_v41 = vld [vmem:[%s1589_s30 + $0x88] sm:$0x3]  ;;  %v183_v42 = vld [vmem:[%s1589_s30 + $0x70] sm:$0x3]  ;;  %v249_v45 = vrot.slane %v1630_v33, 1  ;;  %v331_v47 = vrot.slane %v1651_v43, 1 }
  0x20   : > { %1326 = vmatprep.subr.mxu1 %v462_v12  ;;  %1092 = vmatprep.subr.mxu0 %v462_v12  ;;  %v454_v44 = vld [vmem:[%s2380_s1 + $0x88] sm:$0xff]  ;;  %v295_v51 = vrot.slane %v169_v36, 1  ;;  %v296_v52 = vrot.slane %v1640_v37, 1  ;;  %v453_v53 = vld [vmem:[%s2380_s1 + $0x80] sm:$0xff]  ;;  %v272_v54 = vrot.slane %v1645_v41, 1  ;;  %v267_v56 = vrot.slane %v183_v42, 1 }
  0x21   : > { %1342 = vmatpush3.msra.mxu1 %v446_v13  ;;  %1093 = vmatpush3.msra.mxu0 %v446_v13  ;;  %v438_v48 = vld [vmem:[%s2380_s1 + $0x8] sm:$0xff]  ;;  %v1675_v57 = vsel %vm248_vm1, %v330_v38, %v331_v47  ;;  %v437_v58 = vld [vmem:[%s2380_s1] sm:$0xff]  ;;  %v1681_v59 = vsel %vm248_vm1, %v269_v39, %v270_v40  ;;  %v171_v60 = vld [vmem:[%s1589_s30 + $0x10] sm:$0x3]  ;;  %v1690_v62 = vsel %vm248_vm1, %v249_v45, %v250_v46  ;;  %v228_v8 = vrot.slane %v1620_v29, 7 }
  0x22   : > { %1327 = vmatprep.subr.mxu1 %v461_v14  ;;  %1094 = vmatprep.subr.mxu0 %v461_v14  ;;  %v1670_v55 = vld [vmem:[%s1589_s30 + $0x28] sm:$0x3]  ;;  %v1685_v61 = vld [vmem:[%s1589_s30 + $0x90] sm:$0xff]  ;;  %v500_v63 = vld [vmem:[%s2380_s1 + $0x1f8] sm:$0xff]  ;;  %v297_v3 = vsel %vm248_vm1, %v295_v51, %v296_v52  ;;  %v1728_v11 = vsel %vm248_vm1, %v270_v40, %v272_v54  ;;  %v1731_v12 = vsel %vm248_vm1, %v265_v50, %v267_v56  ;;  %v304_v13 = vrot.slane %v171_v60, 1 }
  0x23   : > { %1343 = vmatpush3.msra.mxu1 %v445_v15  ;;  %1095 = vmatpush3.msra.mxu0 %v445_v15  ;;  %v1696_v0 = vld [vmem:[%s1589_s30 + $0x98] sm:$0xff]  ;;  %v1699_v1 = vld [vmem:[%s1589_s30 + $0x30] sm:$0xff]  ;;  %v252_v5 = vrot.slane %v1670_v55, 1  ;;  %v1715_v7 = vld [vmem:[%s1589_s30 + $0xa0] sm:$0x3]  ;;  %v274_v14 = vrot.slane %v1685_v61, 1 }
  0x24   : > { %1328 = vmatprep.subr.mxu1 %v460_v16  ;;  %1096 = vmatprep.subr.mxu0 %v460_v16  ;;  %v484_v4 = vld [vmem:[%s2380_s1 + $0x178] sm:$0xff]  ;;  %v499_v10 = vld [vmem:[%s2380_s1 + $0x1f0] sm:$0xff]  ;;  %v1735_v15 = vld [vmem:[%s1589_s30 + $0x40] sm:$0x3]  ;;  %v275_v16 = vrot.slane %v1696_v0, 1  ;;  %v334_v24 = vrot.slane %v1731_v12, 1  ;;  %v305_v40 = vsel %vm248_vm1, %v296_v52, %v304_v13 }
  0x25   : > { %1344 = vmatpush3.msra.mxu1 %v444_v17  ;;  %1097 = vmatpush3.msra.mxu0 %v444_v17  ;;  %v1712_v6 = vld [vmem:[%s1589_s30 + $0x38] sm:$0xff]  ;;  %v254_v17 = vrot.slane %v1699_v1, 1  ;;  %v531_v27 = vld [vmem:[%s2380_s1 + $0x2f0] sm:$0xff]  ;;  %v257_v29 = vrot.slane %v1735_v15, 1  ;;  %v340_v36 = vrot.slane %v228_v8, 1  ;;  %v498_v38 = vld [vmem:[%s2380_s1 + $0x1e8] sm:$0xff] }
  0x26   : > { %1329 = vmatprep.subr.mxu1 %v459_v18  ;;  %1098 = vmatprep.subr.mxu0 %v459_v18  ;;  %v532_v9 = vld [vmem:[%s2380_s1 + $0x2f8] sm:$0xff]  ;;  %v255_v22 = vrot.slane %v1712_v6, 1  ;;  %v515_v39 = vld [vmem:[%s2380_s1 + $0x270] sm:$0xff]  ;;  %v1792_v42 = vsel %vm248_vm1, %v274_v14, %v275_v16  ;;  %v497_v49 = vld [vmem:[%s2380_s1 + $0x1e0] sm:$0xff]  ;;  %v344_v50 = vrot.slane %v1728_v11, 1  ;;  %v348_v52 = vrot.slane %v272_v54, 1 }
  0x27   : > { %1345 = vmatpush3.msra.mxu1 %v443_v19  ;;  %1099 = vmatpush3.msra.mxu0 %v443_v19  ;;  %v1741_v18 = vld [vmem:[%s1589_s30 + $0xb8] sm:$0x3]  ;;  %v336_v19 = vrot.slane %v226_v31, 1  ;;  %v1833_v54 = vld [vmem:[%s1589_s30 + $0xd0] sm:$0x3]  ;;  %v513_v13 = vld [vmem:[%s2380_s1 + $0x260] sm:$0xff] }
  0x28   : > { %1330 = vmatprep.subr.mxu1 %v458_v20  ;;  %1100 = vmatprep.subr.mxu0 %v458_v20  ;;  %v338_v20 = vrot.slane %v267_v56, 1  ;;  %v282_v31 = vrot.slane %v1741_v18, 1  ;;  %v1799_v45 = vsel %vm248_vm1, %v254_v17, %v255_v22  ;;  %v514_v56 = vld [vmem:[%s2380_s1 + $0x268] sm:$0xff] }
  0x29   : > { %1346 = vmatpush3.msra.mxu1 %v442_v21  ;;  %1101 = vmatpush3.msra.mxu0 %v442_v21  ;;  %v516_v21 = vld [vmem:[%s2380_s1 + $0x278] sm:$0xff]  ;;  %v1864_v14 = vld [vmem:[%s1589_s30 + $0xc8] sm:$0xff] }
  0x2a   : > { %1331 = vmatprep.subr.mxu1 %v457_v23  ;;  %1102 = vmatprep.subr.mxu0 %v457_v23  ;;  %v277_v23 = vrot.slane %v1715_v7, 1 }
  0x2b   : > { %1347 = vmatpush3.msra.mxu1 %v441_v25  ;;  %1103 = vmatpush3.msra.mxu0 %v441_v25  ;;  %v229_v25 = vrot.slane %v1623_v30, 7  ;;  %v1768_v30 = vld [vmem:[%s1589_s30 + $0xb0] sm:$0xff] }
  0x2c   : > { %1332 = vmatprep.subr.mxu1 %v456_v26  ;;  %1104 = vmatprep.subr.mxu0 %v456_v26  ;;  %v483_v26 = vld [vmem:[%s2380_s1 + $0x170] sm:$0xff]  ;;  %v280_v37 = vrot.slane %v1768_v30, 1 }
  0x2d   : > { %1348 = vmatpush3.msra.mxu1 %v440_v28  ;;  %1105 = vmatpush3.msra.mxu0 %v440_v28  ;;  %v1764_v28 = vsel %vm248_vm1, %v250_v46, %v252_v5  ;;  %v230_v43 = vsel %vm215_vm0, %v228_v8, %v229_v25  ;;  %v1802_v46 = vsel %vm248_vm1, %v275_v16, %v277_v23  ;;  %v346_v51 = vrot.slane %v229_v25, 1 }
  0x2e   : > { %1333 = vmatprep.subr.mxu1 %v455_v32  ;;  %1106 = vmatprep.subr.mxu0 %v455_v32  ;;  %v1774_v32 = vsel %vm248_vm1, %v331_v47, %v336_v19  ;;  %v341_v47 = vrot.slane %v230_v43, 1  ;;  %v1830_v41 = vsel %vm248_vm1, %v280_v37, %v282_v31  ;;  %v1854_v8 = vsel %vm248_vm1, %v344_v50, %v348_v52 }
  0x2f   : > { %1349 = vmatpush3.msra.mxu1 %v439_v35  ;;  %1107 = vmatpush3.msra.mxu0 %v439_v35  ;;  %v1779_v35 = vsel %vm248_vm1, %v334_v24, %v338_v20  ;;  %v358_v19 = vrot.slane %v277_v23, 1  ;;  %v238_v25 = vrot.slane %v1864_v14, 7  ;;  %v368_v43 = vrot.slane %v282_v31, 1 }
  0x30   : > { %1334 = vmatprep.subr.mxu1 %v454_v44  ;;  %1108 = vmatprep.subr.mxu0 %v454_v44  ;;  %v482_v44 = vld [vmem:[%s2380_s1 + $0x168] sm:$0xff]  ;;  %v1836_v60 = vsel %vm248_vm1, %v340_v36, %v341_v47  ;;  %v1849_v7 = vsel %vm248_vm1, %v341_v47, %v346_v51  ;;  %v197_v47 = vld [vmem:[%s1589_s30 + $0xe0] sm:$0xff] }
  0x31   : > { %1350 = vmatpush3.msra.mxu1 %v438_v48  ;;  %1109 = vmatpush3.msra.mxu0 %v438_v48  ;;  %v530_v48 = vld [vmem:[%s2380_s1 + $0x2e8] sm:$0xff]  ;;  %v1900_v51 = vld [vmem:[%s1589_s30 + $0xc0] sm:$0xff] }
  0x32   : > { %1335 = vmatprep.subr.mxu1 %v453_v53  ;;  %1110 = vmatprep.subr.mxu0 %v453_v53  ;;  %v231_v53 = vrot.slane %v1685_v61, 7  ;;  %v232_v61 = vrot.slane %v1696_v0, 7  ;;  %v1879_v36 = vld [vmem:[%s1589_s30 + $0x48] sm:$0xff] }
  0x33   : > { %1351 = vmatpush3.msra.mxu1 %v437_v58  ;;  %644 = vmatprep.mubr.f32.mxu1 %v1681_v59 }
  0x34   : > { %1111 = vmatpush3.msra.mxu0 %v437_v58  ;;  %604 = vmatprep.mubr.f32.mxu0 %v1690_v62  ;;  %v1823_v58 = vsel %vm248_vm1, %v255_v22, %v257_v29  ;;  %v350_v0 = vrot.slane %v231_v53, 1  ;;  %v233_v16 = vsel %vm215_vm0, %v231_v53, %v232_v61  ;;  %v356_v17 = vrot.slane %v232_v61, 1  ;;  %v528_v22 = vld [vmem:[%s2380_s1 + $0x2d8] sm:$0xff] }
  0x35   : > { %645 = vmatmul.mubr.f32.vlgmr.msra.gmra.mxu1 %v1702_v2  ;;  %1160 = vmatprep.subr.mxu1 %v500_v63  ;;  %v481_v63 = vld [vmem:[%s2380_s1 + $0x160] sm:$0xff]  ;;  %v351_v23 = vrot.slane %v233_v16, 1  ;;  %v285_v16 = vrot.slane %v1864_v14, 1  ;;  %v216_v14 = vrot.slane %v1630_v33, 7  ;;  %v520_v33 = vld [vmem:[%s2380_s1 + $0x298] sm:$0xff] }
  0x36   : > { %605 = vmatmul.mubr.f32.vlgmr.msra.gmra.mxu0 %v297_v3  ;;  %1161 = vmatpush3.msra.mxu1 %v484_v4  ;;  %v529_v3 = vld [vmem:[%s2380_s1 + $0x2e0] sm:$0xff]  ;;  %v1846_v4 = vld [vmem:[%s1589_s30 + $0xa8] sm:$0xff] }
  0x37   : > { %1240 = vmatprep.subr.mxu0 %v532_v9  ;;  %1162 = vmatprep.subr.mxu1 %v499_v10  ;;  %v354_v9 = vrot.slane %v1802_v46, 1  ;;  %v496_v10 = vld [vmem:[%s2380_s1 + $0x1d8] sm:$0xff]  ;;  %v234_v20 = vrot.slane %v1846_v4, 7  ;;  %v1903_v18 = vsel %vm248_vm1, %v350_v0, %v351_v23  ;;  %v1906_v31 = vsel %vm248_vm1, %v351_v23, %v356_v17 }
  0x38   : > { %1241 = vmatpush3.msra.mxu0 %v516_v21  ;;  %649 = vmatprep.mubr.f32.mxu1 %v1728_v11  ;;  %v480_v21 = vld [vmem:[%s2380_s1 + $0x158] sm:$0xff]  ;;  %v279_v61 = vrot.slane %v1846_v4, 1  ;;  %v198_v4 = vld [vmem:[%s1589_s30 + $0xe8] sm:$0x3] }
  0x39   : > { %1163 = vmatpush3.msra.mxu1 %v483_v26  ;;  %1242 = vmatprep.subr.mxu0 %v531_v27  ;;  %v287_v26 = vrot.slane %v1833_v54, 1  ;;  %v235_v27 = vrot.slane %v1768_v30, 7  ;;  %v527_v54 = vld [vmem:[%s2380_s1 + $0x2d0] sm:$0xff]  ;;  %v525_v30 = vld [vmem:[%s2380_s1 + $0x2c0] sm:$0xff] }
  0x3a   : > { %609 = vmatprep.mubr.f32.mxu0 %v1764_v28  ;;  %650 = vmatmul.mubr.f32.gmra.mxu1 %v1731_v12 }
  0x3b   : > { %1164 = vmatprep.subr.mxu1 %v498_v38  ;;  %1243 = vmatpush3.msra.mxu0 %v515_v39  ;;  %v1884_v38 = vsel %vm248_vm1, %v354_v9, %v358_v19  ;;  %v360_v39 = vrot.slane %v234_v20, 1  ;;  %v236_v52 = vsel %vm215_vm0, %v234_v20, %v235_v27  ;;  %v366_v53 = vrot.slane %v235_v27, 1 }
  0x3c   : > { %610 = vmatmul.mubr.f32.gmra.mxu0 %v305_v40  ;;  %1165 = vmatpush3.msra.mxu1 %v482_v44  ;;  %v2384_v40 = vrot.slane %v1830_v41, 1  ;;  %v196_v44 = vld [vmem:[%s1589_s30 + $0xd8] sm:$0xff]  ;;  %v371_v19 = vrot.slane %v197_v47, 1 }
  0x3d   : > { %1244 = vmatprep.subr.mxu0 %v530_v48  ;;  %1166 = vmatprep.subr.mxu1 %v497_v49  ;;  %v495_v48 = vld [vmem:[%s2380_s1 + $0x1d0] sm:$0xff]  ;;  %v512_v49 = vld [vmem:[%s2380_s1 + $0x258] sm:$0xff]  ;;  %v370_v17 = vrot.slane %v196_v44, 1 }
  0x3e   : > { %1245 = vmatpush3.msra.mxu0 %v514_v56  ;;  %654 = vmatprep.mubr.f32.mxu1 %v1792_v42  ;;  %v479_v56 = vld [vmem:[%s2380_s1 + $0x150] sm:$0xff]  ;;  %v1922_v0 = vsel %vm248_vm1, %v2384_v40, %v368_v43  ;;  %v222_v40 = vrot.slane %v1879_v36, 7 }
  0x3f   : > { %1167 = vmatpush3.msra.mxu1 %v481_v63  ;;  %1246 = vmatprep.subr.mxu0 %v529_v3  ;;  %v1917_v63 = vld [vmem:[%s1589_s30 + $0x50] sm:$0xff]  ;;  %v361_v3 = vrot.slane %v236_v52, 1  ;;  %v1949_v47 = vsel %vm248_vm1, %v370_v17, %v371_v19 }
  0x40   : > { %614 = vmatprep.mubr.f32.mxu0 %v1799_v45  ;;  %655 = vmatmul.mubr.f32.gmra.mxu1 %v1681_v59  ;;  %v260_v52 = vrot.slane %v1917_v63, 1  ;;  %v223_v55 = vrot.slane %v1917_v63, 7 }
  0x41   : > { %1168 = vmatprep.subr.mxu1 %v496_v10  ;;  %1247 = vmatpush3.msra.mxu0 %v513_v13  ;;  %v237_v10 = vrot.slane %v1900_v51, 7  ;;  %v259_v13 = vrot.slane %v1879_v36, 1  ;;  %v1930_v20 = vsel %vm248_vm1, %v360_v39, %v361_v3  ;;  %v1933_v23 = vsel %vm248_vm1, %v361_v3, %v366_v53 }
  0x42   : > { %615 = vmatmul.mubr.f32.gmra.mxu0 %v1690_v62  ;;  %1169 = vmatpush3.msra.mxu1 %v480_v21  ;;  %v494_v21 = vld [vmem:[%s2380_s1 + $0x1c8] sm:$0xff]  ;;  %v1946_v39 = vsel %vm248_vm1, %v285_v16, %v287_v26  ;;  %v379_v3 = vrot.slane %v198_v4, 1  ;;  %v1976_v4 = vsel %vm248_vm1, %v279_v61, %v280_v37  ;;  %v1994_v37 = vld [vmem:[%s1589_s30 + $0x58] sm:$0x3]  ;;  %v224_v36 = vsel %vm215_vm0, %v222_v40, %v223_v55  ;;  %s2339_s30 = scalar_lea.sflag [#allocation3], %s161_s29 }
  0x43   : > { %1248 = vmatprep.subr.mxu0 %v528_v22  ;;  %1170 = vmatprep.subr.mxu1 %v495_v48  ;;  %v239_v27 = vsel %vm215_vm0, %v237_v10, %v238_v25  ;;  %v373_v43 = vrot.slane %v237_v10, 1  ;;  %v511_v22 = vld [vmem:[%s2380_s1 + $0x250] sm:$0xff]  ;;  %v381_v48 = vrot.slane %v238_v25, 1  ;;  %v2383_v53 = vrot.slane %v1946_v39, 1  ;;  %v526_v25 = vld [vmem:[%s2380_s1 + $0x2c8] sm:$0xff] }
  0x44   : > { %1249 = vmatpush3.msra.mxu0 %v512_v49  ;;  %659 = vmatprep.mubr.f32.mxu1 %v1802_v46  ;;  %v374_v44 = vrot.slane %v239_v27, 1  ;;  %v478_v49 = vld [vmem:[%s2380_s1 + $0x148] sm:$0xff]  ;;  %v383_v10 = vrot.slane %v287_v26, 1  ;;  %v1979_v27 = vsel %vm248_vm1, %v371_v19, %v379_v3  ;;  %v1997_v61 = vsel %vm248_vm1, %v259_v13, %v260_v52  ;;  %v492_v19 = vld [vmem:[%s2380_s1 + $0x1b8] sm:$0xff] }
  0x45   : > { %1171 = vmatpush3.msra.mxu1 %v479_v56  ;;  %1250 = vmatprep.subr.mxu0 %v527_v54  ;;  %v493_v56 = vld [vmem:[%s2380_s1 + $0x1c0] sm:$0xff]  ;;  %v510_v26 = vld [vmem:[%s2380_s1 + $0x248] sm:$0xff]  ;;  %v262_v13 = vrot.slane %v1994_v37, 1  ;;  %v508_v3 = vld [vmem:[%s2380_s1 + $0x238] sm:$0xff] }
  0x46   : > { %619 = vmatprep.mubr.f32.mxu0 %v1823_v58  ;;  %660 = vmatmul.mubr.f32.gmra.mxu1 %v1728_v11  ;;  %v1965_v54 = vsel %vm248_vm1, %v373_v43, %v374_v44  ;;  %v1968_v17 = vsel %vm248_vm1, %v374_v44, %v381_v48  ;;  %v1984_v43 = vsel %vm248_vm1, %v2383_v53, %v383_v10  ;;  %v476_v44 = vld [vmem:[%s2380_s1 + $0x138] sm:$0xff]  ;;  %v475_v10 = vld [vmem:[%s2380_s1 + $0x130] sm:$0xff] }
  0x47   : > { %1172 = vmatprep.subr.mxu1 %v494_v21  ;;  %1251 = vmatpush3.msra.mxu0 %v511_v22  ;;  %v477_v21 = vld [vmem:[%s2380_s1 + $0x140] sm:$0xff]  ;;  %v524_v48 = vld [vmem:[%s2380_s1 + $0x2b8] sm:$0xff] }
  0x48   : > { %620 = vmatmul.mubr.f32.gmra.mxu0 %v1764_v28  ;;  %1173 = vmatpush3.msra.mxu1 %v478_v49  ;;  %v509_v22 = vld [vmem:[%s2380_s1 + $0x240] sm:$0xff]  ;;  %v491_v49 = vld [vmem:[%s2380_s1 + $0x1b0] sm:$0xff] }
  0x49   : > { %1252 = vmatprep.subr.mxu0 %v526_v25  ;;  %1174 = vmatprep.subr.mxu1 %v493_v56  ;;  %v523_v25 = vld [vmem:[%s2380_s1 + $0x2b0] sm:$0xff]  ;;  %v2031_v56 = vsel %vm248_vm1, %v260_v52, %v262_v13  ;;  %v474_v52 = vld [vmem:[%s2380_s1 + $0x128] sm:$0xff] }
  0x4a   : > { %1253 = vmatpush3.msra.mxu0 %v510_v26  ;;  %664 = vmatprep.mubr.f32.mxu1 %v1976_v4  ;;  %v284_v26 = vrot.slane %v1900_v51, 1  ;;  %v522_v51 = vld [vmem:[%s2380_s1 + $0x2a8] sm:$0xff] }
  0x4b   : > { %1175 = vmatpush3.msra.mxu1 %v477_v21  ;;  %1254 = vmatprep.subr.mxu0 %v525_v30  ;;  %v490_v21 = vld [vmem:[%s2380_s1 + $0x1a8] sm:$0xff]  ;;  %v507_v30 = vld [vmem:[%s2380_s1 + $0x230] sm:$0xff] }
  0x4c   : > { %624 = vmatprep.mubr.f32.mxu0 %v1997_v61  ;;  %665 = vmatmul.mubr.f32.gmra.mxu1 %v1792_v42 }
  0x4d   : > { %1176 = vmatprep.subr.mxu1 %v492_v19  ;;  %1255 = vmatpush3.msra.mxu0 %v509_v22  ;;  %v489_v19 = vld [vmem:[%s2380_s1 + $0x1a0] sm:$0xff]  ;;  %v506_v22 = vld [vmem:[%s2380_s1 + $0x228] sm:$0xff] }
  0x4e   : > { %625 = vmatmul.mubr.f32.gmra.mxu0 %v1799_v45  ;;  %1177 = vmatpush3.msra.mxu1 %v476_v44  ;;  %v2058_v44 = vsel %vm248_vm1, %v284_v26, %v285_v16  ;;  %v488_v16 = vld [vmem:[%s2380_s1 + $0x198] sm:$0xff] }
  0x4f   : > { %1256 = vmatprep.subr.mxu0 %v524_v48  ;;  %1178 = vmatprep.subr.mxu1 %v491_v49  ;;  %v473_v48 = vld [vmem:[%s2380_s1 + $0x120] sm:$0xff]  ;;  %v504_v26 = vld [vmem:[%s2380_s1 + $0x218] sm:$0xff] }
  0x50   : > { %1257 = vmatpush3.msra.mxu0 %v508_v3  ;;  %669 = vmatprep.mubr.f32.mxu1 %v1830_v41  ;;  %v521_v49 = vld [vmem:[%s2380_s1 + $0x2a0] sm:$0xff]  ;;  %v217_v3 = vrot.slane %v1633_v34, 7  ;;  %v472_v34 = vld [vmem:[%s2380_s1 + $0x118] sm:$0xff] }
  0x51   : > { %1179 = vmatpush3.msra.mxu1 %v475_v10  ;;  %1258 = vmatprep.subr.mxu0 %v523_v25  ;;  %v505_v10 = vld [vmem:[%s2380_s1 + $0x220] sm:$0xff]  ;;  %v487_v25 = vld [vmem:[%s2380_s1 + $0x190] sm:$0xff] }
  0x52   : > { %629 = vmatprep.mubr.f32.mxu0 %v2031_v56  ;;  %670 = vmatmul.mubr.f32.gmra.mxu1 %v1802_v46 }
  0x53   : > { %1180 = vmatprep.subr.mxu1 %v490_v21  ;;  %1259 = vmatpush3.msra.mxu0 %v507_v30  ;;  %v218_v21 = vsel %vm215_vm0, %v216_v14, %v217_v3  ;;  %v471_v30 = vld [vmem:[%s2380_s1 + $0x110] sm:$0xff] }
  0x54   : > { %630 = vmatmul.mubr.f32.gmra.mxu0 %v1823_v58  ;;  %1181 = vmatpush3.msra.mxu1 %v474_v52  ;;  %v519_v52 = vld [vmem:[%s2380_s1 + $0x290] sm:$0xff] }
  0x55   : > { %1260 = vmatprep.subr.mxu0 %v522_v51  ;;  %1182 = vmatprep.subr.mxu1 %v489_v19  ;;  %v219_v51 = vrot.slane %v1699_v1, 7  ;;  %v220_v19 = vrot.slane %v1712_v6, 7  ;;  %v470_v1 = vld [vmem:[%s2380_s1 + $0x108] sm:$0xff] }
  0x56   : > { %1261 = vmatpush3.msra.mxu0 %v506_v22  ;;  %674 = vmatprep.mubr.f32.mxu1 %v2058_v44  ;;  %v486_v22 = vld [vmem:[%s2380_s1 + $0x188] sm:$0xff] }
  0x57   : > { %1183 = vmatpush3.msra.mxu1 %v473_v48  ;;  %1262 = vmatprep.subr.mxu0 %v521_v49  ;;  %v503_v48 = vld [vmem:[%s2380_s1 + $0x210] sm:$0xff]  ;;  %v298_v49 = vrot.slane %v216_v14, 1  ;;  %v518_v6 = vld [vmem:[%s2380_s1 + $0x288] sm:$0xff]  ;;  %v301_v14 = vrot.slane %v1690_v62, 1 }
  0x58   : > { %634 = vmatprep.mubr.f32.mxu0 %v1702_v2  ;;  %675 = vmatmul.mubr.f32.gmra.mxu1 %v1976_v4 }
  0x59   : > { %1184 = vmatprep.subr.mxu1 %v488_v16  ;;  %1263 = vmatpush3.msra.mxu0 %v505_v10  ;;  %v299_v16 = vrot.slane %v218_v21, 1  ;;  %v485_v10 = vld [vmem:[%s2380_s1 + $0x180] sm:$0xff]  ;;  %v221_v21 = vsel %vm215_vm0, %v219_v51, %v220_v19 }
  0x5a   : > { %635 = vmatmul.mubr.f32.gmra.mxu0 %v1997_v61  ;;  %1185 = vmatpush3.msra.mxu1 %v472_v34  ;;  %v302_v34 = vrot.slane %v1764_v28, 1  ;;  %v311_v53 = vrot.slane %v221_v21, 1  ;;  %v333_v21 = vrot.slane %v1702_v2, 1 }
  0x5b   : > { %1264 = vmatprep.subr.mxu0 %v520_v33  ;;  %1186 = vmatprep.subr.mxu1 %v487_v25  ;;  %v306_v33 = vrot.slane %v217_v3, 1  ;;  %v502_v25 = vld [vmem:[%s2380_s1 + $0x208] sm:$0xff]  ;;  %v517_v3 = vld [vmem:[%s2380_s1 + $0x280] sm:$0xff] }
  0x5c   : > { %1265 = vmatpush3.msra.mxu0 %v504_v26  ;;  %679 = vmatprep.mubr.f32.mxu1 %v1946_v39  ;;  %v469_v26 = vld [vmem:[%s2380_s1 + $0x100] sm:$0xff]  ;;  %v335_v37 = vsel %vm248_vm1, %v333_v21, %v334_v24 }
  0x5d   : > { %1187 = vmatpush3.msra.mxu1 %v471_v30  ;;  %1266 = vmatprep.subr.mxu0 %v519_v52  ;;  %v300_v30 = vsel %vm248_vm1, %v298_v49, %v299_v16  ;;  %v308_v52 = vrot.slane %v252_v5, 1  ;;  %v310_v49 = vrot.slane %v219_v51, 1 }
  0x5e   : > { %639 = vmatprep.mubr.f32.mxu0 %v1731_v12  ;;  %680 = vmatmul.mubr.f32.gmra.mxu1 %v1830_v41 }
  0x5f   : > { %1188 = vmatprep.subr.mxu1 %v486_v22  ;;  %1267 = vmatpush3.msra.mxu0 %v503_v48  ;;  %v501_v22 = vld [vmem:[%s2380_s1 + $0x200] sm:$0xff]  ;;  %v303_v48 = vsel %vm248_vm1, %v301_v14, %v302_v34  ;;  %v309_v5 = vsel %vm248_vm1, %v302_v34, %v308_v52  ;;  %v312_v51 = vsel %vm248_vm1, %v310_v49, %v311_v53  ;;  %v318_v14 = vrot.slane %v257_v29, 1 }
  0x60   : > { %640 = vmatmul.mubr.f32.gmra.mxu0 %v2031_v56  ;;  %1189 = vmatpush3.msra.mxu1 %v470_v1  ;;  %v307_v1 = vsel %vm248_vm1, %v299_v16, %v306_v33  ;;  %v316_v16 = vrot.slane %v220_v19, 1  ;;  %v320_v33 = vrot.slane %v222_v40, 1  ;;  %v326_v29 = vrot.slane %v223_v55, 1 }
  0x61   : > { %1268 = vmatprep.subr.mxu0 %v518_v6  ;;  %1190 = vmatprep.subr.mxu1 %v485_v10  ;;  %v313_v6 = vrot.slane %v1799_v45, 1  ;;  %v314_v10 = vrot.slane %v1823_v58, 1  ;;  %v328_v40 = vrot.slane %v262_v13, 1 }
  0x62   : > { %1269 = vmatpush3.msra.mxu0 %v502_v25  ;;  %1191 = vmatpush3.msra.mxu1 %v469_v26  ;;  %v317_v34 = vsel %vm248_vm1, %v311_v53, %v316_v16  ;;  %v323_v25 = vrot.slane %v1997_v61, 1  ;;  %v324_v26 = vrot.slane %v2031_v56, 1 }
  0x63   : > { %749 = vmatprep.mubr.f32.mxu1 %v300_v30  ;;  %1270 = vmatprep.subr.mxu0 %v517_v3  ;;  %v315_v63 = vsel %vm248_vm1, %v313_v6, %v314_v10  ;;  %v319_v19 = vsel %vm248_vm1, %v314_v10, %v318_v14  ;;  %v2269_v6 = vld [vmem:[%s2381_s2] ss:$0 sm:$0xff] }
  0x64   : > { %750 = vmatmul.mubr.f32.vlgmr.msra.gmra.mxu1 %v1799_v45  ;;  %1271 = vmatpush3.msra.mxu0 %v501_v22 }
  0x65   : > { %894 = vmatprep.mubr.f32.mxu0 %v303_v48  ;;  %754 = vmatprep.mubr.f32.mxu1 %v307_v1 }
  0x66   : > { %895 = vmatmul.mubr.f32.vlgmr.msra.gmra.mxu0 %v1690_v62  ;;  %v321_v62 = vrot.slane %v224_v36, 1 }
  0x67   : > { %899 = vmatprep.mubr.f32.mxu0 %v309_v5 }
  0x68   : > { %755 = vmatmul.mubr.f32.gmra.mxu1 %v1823_v58  ;;  %v322_v15 = vsel %vm248_vm1, %v320_v33, %v321_v62  ;;  %v327_v53 = vsel %vm248_vm1, %v321_v62, %v326_v29 }
  0x69   : > { %759 = vmatprep.mubr.f32.mxu1 %v312_v51 }
  0x6a   : > { %900 = vmatmul.mubr.f32.gmra.mxu0 %v1764_v28  ;;  %v325_v28 = vsel %vm248_vm1, %v323_v25, %v324_v26 }
  0x6b   : > { %904 = vmatprep.mubr.f32.mxu0 %v315_v63 }
  0x6c   : > { %760 = vmatmul.mubr.f32.gmra.mxu1 %v1997_v61 }
  0x6d   : > { %764 = vmatprep.mubr.f32.mxu1 %v317_v34 }
  0x6e   : > { %905 = vmatmul.mubr.f32.gmra.mxu0 %v1799_v45  ;;  %v329_v45 = vsel %vm248_vm1, %v324_v26, %v328_v40 }
  0x6f   : > { %909 = vmatprep.mubr.f32.mxu0 %v319_v19 }
  0x70   : > { %765 = vmatmul.mubr.f32.gmra.mxu1 %v2031_v56 }
  0x71   : > { %769 = vmatprep.mubr.f32.mxu1 %v322_v15 }
  0x72   : > { %910 = vmatmul.mubr.f32.gmra.mxu0 %v1823_v58  ;;  %v343_v58 = vrot.slane %v1681_v59, 1 }
  0x73   : > { %914 = vmatprep.mubr.f32.mxu0 %v325_v28 }
  0x74   : > { %770 = vmatmul.mubr.f32.gmra.mxu1 %v1702_v2  ;;  %v345_v24 = vsel %vm248_vm1, %v343_v58, %v344_v50 }
  0x75   : > { %774 = vmatprep.mubr.f32.mxu1 %v327_v53 }
  0x76   : > { %915 = vmatmul.mubr.f32.gmra.mxu0 %v1997_v61 }
  0x77   : > { %919 = vmatprep.mubr.f32.mxu0 %v329_v45 }
  0x78   : > { %775 = vmatmul.mubr.f32.gmra.mxu1 %v1731_v12 }
  0x79   : > { %779 = vmatprep.mubr.f32.mxu1 %v1675_v57  ;;  %v353_v57 = vrot.slane %v1792_v42, 1 }
  0x7a   : > { %920 = vmatmul.mubr.f32.gmra.mxu0 %v2031_v56 }
  0x7b   : > { %924 = vmatprep.mubr.f32.mxu0 %v335_v37 }
  0x7c   : > { %780 = vmatmul.mubr.f32.gmra.mxu1 %v1681_v59 }
  0x7d   : > { %784 = vmatprep.mubr.f32.mxu1 %v1774_v32 }
  0x7e   : > { %925 = vmatmul.mubr.f32.gmra.mxu0 %v1702_v2  ;;  %v355_v2 = vsel %vm248_vm1, %v353_v57, %v354_v9 }
  0x7f   : > { %929 = vmatprep.mubr.f32.mxu0 %v1779_v35  ;;  %v2388_v35 = vrot.slane %v1946_v39, 1 }
  0x80   : > { %785 = vmatmul.mubr.f32.gmra.mxu1 %v1728_v11 }
  0x81   : > { %789 = vmatprep.mubr.f32.mxu1 %v1836_v60 }
  0x82   : > { %930 = vmatmul.mubr.f32.gmra.mxu0 %v1731_v12  ;;  %v363_v12 = vrot.slane %v1976_v4, 1 }
  0x83   : > { %934 = vmatprep.mubr.f32.mxu0 %v345_v24 }
  0x84   : > { %790 = vmatmul.mubr.f32.gmra.mxu1 %v1792_v42 }
  0x85   : > { %794 = vmatprep.mubr.f32.mxu1 %v1849_v7 }
  0x86   : > { %935 = vmatmul.mubr.f32.gmra.mxu0 %v1681_v59  ;;  %v2387_v59 = vrot.slane %v1830_v41, 1 }
  0x87   : > { %939 = vmatprep.mubr.f32.mxu0 %v1854_v8 }
  0x88   : > { %795 = vmatmul.mubr.f32.gmra.mxu1 %v1802_v46  ;;  %v365_v32 = vsel %vm248_vm1, %v363_v12, %v2387_v59 }
  0x89   : > { %799 = vmatprep.mubr.f32.mxu1 %v1903_v18 }
  0x8a   : > { %940 = vmatmul.mubr.f32.gmra.mxu0 %v1728_v11  ;;  %v376_v11 = vrot.slane %v2058_v44, 1 }
  0x8b   : > { %944 = vmatprep.mubr.f32.mxu0 %v355_v2 }
  0x8c   : > { %800 = vmatmul.mubr.f32.gmra.mxu1 %v1976_v4 }
  0x8d   : > { %804 = vmatprep.mubr.f32.mxu1 %v1906_v31 }
  0x8e   : > { %945 = vmatmul.mubr.f32.gmra.mxu0 %v1792_v42  ;;  %v378_v42 = vsel %vm248_vm1, %v376_v11, %v2388_v35 }
  0x8f   : > { %949 = vmatprep.mubr.f32.mxu0 %v1884_v38 }
  0x90   : > { %805 = vmatmul.mubr.f32.gmra.mxu1 %v1830_v41 }
  0x91   : > { %809 = vmatprep.mubr.f32.mxu1 %v1930_v20 }
  0x92   : > { %950 = vmatmul.mubr.f32.gmra.mxu0 %v1802_v46 }
  0x93   : > { %954 = vmatprep.mubr.f32.mxu0 %v365_v32 }
  0x94   : > { %810 = vmatmul.mubr.f32.gmra.mxu1 %v2058_v44 }
  0x95   : > { %814 = vmatprep.mubr.f32.mxu1 %v1933_v23 }
  0x96   : > { %955 = vmatmul.mubr.f32.gmra.mxu0 %v1976_v4 }
  0x97   : > { %959 = vmatprep.mubr.f32.mxu0 %v1922_v0 }
  0x98   : > { %815 = vmatmul.mubr.f32.gmra.mxu1 %v1946_v39 }
  0x99   : > { %819 = vmatprep.mubr.f32.mxu1 %v1965_v54 }
  0x9a   : > { %960 = vmatmul.mubr.f32.gmra.mxu0 %v1830_v41 }
  0x9b   : > { %964 = vmatprep.mubr.f32.mxu0 %v378_v42 }
  0x9c   : > { %820 = vmatmul.mubr.f32.gmra.mxu1 %v1949_v47 }
  0x9d   : > { %824 = vmatprep.mubr.f32.mxu1 %v1968_v17 }
  0x9e   : > { %965 = vmatmul.mubr.f32.gmra.mxu0 %v2058_v44 }
  0x9f   : > { %969 = vmatprep.mubr.f32.mxu0 %v1984_v43 }
  0xa0   : > { %825 = vmatmul.mubr.f32.gmra.mxu1 %v1979_v27 }
  0xa2   : > { %970 = vmatmul.mubr.f32.gmra.mxu0 %v1946_v39 }
  0xf5   : > { %v2226_v46 = vpop.f32.mrf.mxu1 }
  0xf6   : > { %v1112_v50 = vpop.f32.mrf.mxu0 }
  0xf7   : > { %v2228_v60 = vpop.f32.mrf.mxu1 }
  0xf8   : > { %v1113_v7 = vpop.f32.mrf.mxu0 }
  0xf9   : > { %v1114_v5 = vadd.f32 %v1113_v7, %v1112_v50 }
  0xfa   : > { %v2230_v41 = vpop.f32.mrf.mxu1 }
  0xfb   : > { %v607_v36 = vadd.f32 %v1114_v5, %v2269_v6 }
  0xfc   : > { %v1115_v8 = vpop.f32.mrf.mxu0  ;;  %v2232_v9 = vpop.f32.mrf.mxu1 }
  0xfe   : > { %v1116_v38 = vpop.f32.mrf.mxu0 }
  0xff   : > { %v1117_v63 = vadd.f32 %v1116_v38, %v1115_v8 }
 0x100   : > { %v2234_v18 = vpop.f32.mrf.mxu1 }
 0x101   : > { %v612_v15 = vadd.f32 %v1117_v63, %v2269_v6 }
 0x102   : > { %v1118_v31 = vpop.f32.mrf.mxu0  ;;  %v2236_v0 = vpop.f32.mrf.mxu1 }
 0x104   : > { %v1119_v20 = vpop.f32.mrf.mxu0 }
 0x105   : > { %v1120_v29 = vadd.f32 %v1119_v20, %v1118_v31 }
 0x106   : > { %v2238_v23 = vpop.f32.mrf.mxu1 }
 0x107   : > { %v617_v57 = vadd.f32 %v1120_v29, %v2269_v6 }
 0x108   : > { %v1121_v39 = vpop.f32.mrf.mxu0  ;;  %v2240_v47 = vpop.f32.mrf.mxu1 }
 0x10a   : > { %v1122_v54 = vpop.f32.mrf.mxu0 }
 0x10b   : > { %v1123_v2 = vadd.f32 %v1122_v54, %v1121_v39 }
 0x10c   : > { %v2242_v17 = vpop.f32.mrf.mxu1 }
 0x10d   : > { %v622_v8 = vadd.f32 %v1123_v2, %v2269_v6 }
 0x10e   : > { %v1124_v4 = vpop.f32.mrf.mxu0  ;;  %v2244_v27 = vpop.f32.mrf.mxu1 }
 0x110   : > { %v1125_v43 = vpop.f32.mrf.mxu0 }
 0x111   : > { %v1126_v38 = vadd.f32 %v1125_v43, %v1124_v4 }
 0x112   : > { %v2246_v61 = vpop.f32.mrf.mxu1 }
 0x114   : > { %v1127_v13 = vpop.f32.mrf.mxu0  ;;  %v2248_v56 = vpop.f32.mrf.mxu1 }
 0x116   : > { %v1128_v44 = vpop.f32.mrf.mxu0 }
 0x117   : > { %v1129_v63 = vadd.f32 %v1128_v44, %v1127_v13 }
 0x118   : > { %v2250_v30 = vpop.f32.mrf.mxu1 }
 0x11a   : > { %v2252_v3 = vpop.f32.mrf.mxu0  ;;  %v2254_v52 = vpop.f32.mrf.mxu1 }
 0x11c   : > { %v2256_v22 = vpop.f32.mrf.mxu0 }
 0x11e   : > { %v2258_v48 = vpop.f32.mrf.mxu1 }
 0x120   : > { %v2260_v1 = vpop.f32.mrf.mxu0  ;;  %v2262_v49 = vpop.f32.mrf.mxu1 }
 0x122   : > { %v2264_v55 = vpop.f32.mrf.mxu0 }
 0x124   : > { %v1192_v10 = vpop.f32.mrf.mxu1 }
 0x126   : > { %v1272_v51 = vpop.f32.mrf.mxu0  ;;  %v1193_v16 = vpop.f32.mrf.mxu1 }
 0x127   : > { %v1194_v14 = vadd.f32 %v1193_v16, %v1192_v10 }
 0x128   : > { %v1273_v34 = vpop.f32.mrf.mxu0  ;;  %v1195_v33 = vpop.f32.mrf.mxu1 }
 0x129   : > { %v752_v62 = vadd.f32 %v1194_v14, %v607_v36  ;;  %v1274_v19 = vadd.f32 %v1273_v34, %v1272_v51  ;;  %v627_v36 = vadd.f32 %v1126_v38, %v2269_v6 }
 0x12a   : > { %v1275_v25 = vpop.f32.mrf.mxu0  ;;  %v1196_v26 = vpop.f32.mrf.mxu1 }
 0x12b   : > { %v897_v28 = vadd.f32 %v1274_v19, %v752_v62  ;;  %v1197_v40 = vadd.f32 %v1196_v26, %v1195_v33  ;;  %v632_v26 = vadd.f32 %v1129_v63, %v2269_v6 }
 0x12c   : > { %v1276_v53 = vpop.f32.mrf.mxu0  ;;  %v1198_v45 = vpop.f32.mrf.mxu1 }
 0x12d   : > { %975 = vst [vmem:[%s2276_s5] sm:$0xff] %v897_v28  ;;  %v757_v21 = vadd.f32 %v1197_v40, %v612_v15  ;;  %v1277_v37 = vadd.f32 %v1276_v53, %v1275_v25  ;;  %v1132_v15 = vadd.f32 %v2256_v22, %v2252_v3 }
 0x12e   : > { %v1278_v58 = vpop.f32.mrf.mxu0  ;;  %v1199_v24 = vpop.f32.mrf.mxu1 }
 0x12f   : > { %v902_v12 = vadd.f32 %v1277_v37, %v757_v21  ;;  %v1200_v59 = vadd.f32 %v1199_v24, %v1198_v45  ;;  %v637_v37 = vadd.f32 %v1132_v15, %v2269_v6 }
 0x130   : > { %v1279_v32 = vpop.f32.mrf.mxu0  ;;  %v1201_v11 = vpop.f32.mrf.mxu1 }
 0x131   : > { %976 = vst [vmem:[%s2276_s5 + $0x8] sm:$0xff] %v902_v12  ;;  %v762_v35 = vadd.f32 %v1200_v59, %v617_v57  ;;  %v1280_v42 = vadd.f32 %v1279_v32, %v1278_v58  ;;  %v1135_v58 = vadd.f32 %v2264_v55, %v2260_v1 }
 0x132   : > { %v1281_v50 = vpop.f32.mrf.mxu0  ;;  %v1202_v7 = vpop.f32.mrf.mxu1 }
 0x133   : > { %v907_v31 = vadd.f32 %v1280_v42, %v762_v35  ;;  %v1203_v20 = vadd.f32 %v1202_v7, %v1201_v11  ;;  %v1138_v11 = vadd.f32 %v2228_v60, %v2226_v46  ;;  %v642_v35 = vadd.f32 %v1135_v58, %v2269_v6 }
 0x134   : > { %v1282_v5 = vpop.f32.mrf.mxu0  ;;  %v1204_v10 = vpop.f32.mrf.mxu1 }
 0x135   : > { %977 = vst [vmem:[%s2276_s5 + $0x10] sm:$0xff] %v907_v31  ;;  %v767_v39 = vadd.f32 %v1203_v20, %v622_v8  ;;  %v1283_v54 = vadd.f32 %v1282_v5, %v1281_v50  ;;  %v647_v20 = vadd.f32 %v1138_v11, %v2269_v6  ;;  %v1141_v5 = vadd.f32 %v2232_v9, %v2230_v41 }
 0x136   : > { %v1284_v51 = vpop.f32.mrf.mxu0  ;;  %v1205_v16 = vpop.f32.mrf.mxu1 }
 0x137   : > { %v912_v14 = vadd.f32 %v1283_v54, %v767_v39  ;;  %v1206_v34 = vadd.f32 %v1205_v16, %v1204_v10  ;;  %v652_v63 = vadd.f32 %v1141_v5, %v2269_v6 }
 0x138   : > { %v1285_v33 = vpop.f32.mrf.mxu0  ;;  %v1207_v62 = vpop.f32.mrf.mxu1 }
 0x139   : > { %978 = vst [vmem:[%s2276_s5 + $0x18] sm:$0xff] %v912_v14  ;;  %v772_v4 = vadd.f32 %v1206_v34, %v627_v36  ;;  %v1286_v43 = vadd.f32 %v1285_v33, %v1284_v51  ;;  %v1144_v14 = vadd.f32 %v2236_v0, %v2234_v18 }
 0x13a   : > { %v1287_v19 = vpop.f32.mrf.mxu0  ;;  %v1208_v25 = vpop.f32.mrf.mxu1 }
 0x13b   : > { %v917_v29 = vadd.f32 %v1286_v43, %v772_v4  ;;  %v1209_v28 = vadd.f32 %v1208_v25, %v1207_v62  ;;  %v657_v25 = vadd.f32 %v1144_v14, %v2269_v6 }
 0x13c   : > { %v1288_v40 = vpop.f32.mrf.mxu0  ;;  %v1210_v13 = vpop.f32.mrf.mxu1 }
 0x13d   : > { %979 = vst [vmem:[%s2276_s5 + $0x20] sm:$0xff] %v917_v29  ;;  %v777_v44 = vadd.f32 %v1209_v28, %v632_v26  ;;  %v1289_v53 = vadd.f32 %v1288_v40, %v1287_v19  ;;  %v1147_v26 = vadd.f32 %v2240_v47, %v2238_v23 }
 0x13e   : > { %v1290_v45 = vpop.f32.mrf.mxu0  ;;  %v1211_v21 = vpop.f32.mrf.mxu1 }
 0x13f   : > { %v922_v24 = vadd.f32 %v1289_v53, %v777_v44  ;;  %v1212_v57 = vadd.f32 %v1211_v21, %v1210_v13  ;;  %v662_v53 = vadd.f32 %v1147_v26, %v2269_v6 }
 0x140   : > { %v1291_v2 = vpop.f32.mrf.mxu0  ;;  %v1213_v3 = vpop.f32.mrf.mxu1 }
 0x141   : > { %980 = vst [vmem:[%s2276_s5 + $0x28] sm:$0xff] %v922_v24  ;;  %v782_v22 = vadd.f32 %v1212_v57, %v637_v37  ;;  %v1292_v12 = vadd.f32 %v1291_v2, %v1290_v45  ;;  %v1150_v45 = vadd.f32 %v2244_v27, %v2242_v17 }
 0x142   : > { %v1293_v59 = vpop.f32.mrf.mxu0  ;;  %v1214_v32 = vpop.f32.mrf.mxu1 }
 0x143   : > { %v927_v42 = vadd.f32 %v1292_v12, %v782_v22  ;;  %v1215_v50 = vadd.f32 %v1214_v32, %v1213_v3  ;;  %v667_v3 = vadd.f32 %v1150_v45, %v2269_v6  ;;  %v1153_v22 = vadd.f32 %v2248_v56, %v2246_v61 }
 0x144   : > { %v1294_v7 = vpop.f32.mrf.mxu0  ;;  %v1216_v1 = vpop.f32.mrf.mxu1 }
 0x145   : > { %981 = vst [vmem:[%s2276_s5 + $0x30] sm:$0xff] %v927_v42  ;;  %v787_v55 = vadd.f32 %v1215_v50, %v642_v35  ;;  %v1295_v8 = vadd.f32 %v1294_v7, %v1293_v59  ;;  %v672_v50 = vadd.f32 %v1153_v22, %v2269_v6  ;;  %v1156_v7 = vadd.f32 %v2254_v52, %v2250_v30 }
 0x146   : > { %v1296_v38 = vpop.f32.mrf.mxu0  ;;  %v1217_v31 = vpop.f32.mrf.mxu1 }
 0x147   : > { %v932_v10 = vadd.f32 %v1295_v8, %v787_v55  ;;  %v1218_v46 = vadd.f32 %v1217_v31, %v1216_v1  ;;  %v677_v5 = vadd.f32 %v1156_v7, %v2269_v6 }
 0x148   : > { %v1297_v60 = vpop.f32.mrf.mxu0  ;;  %v1219_v39 = vpop.f32.mrf.mxu1 }
 0x149   : > { %982 = vst [vmem:[%s2276_s5 + $0x38] sm:$0xff] %v932_v10  ;;  %v792_v54 = vadd.f32 %v1218_v46, %v647_v20  ;;  %v1298_v51 = vadd.f32 %v1297_v60, %v1296_v38  ;;  %v1159_v10 = vadd.f32 %v2262_v49, %v2258_v48 }
 0x14a   : > { %v1299_v16 = vpop.f32.mrf.mxu0  ;;  %v1220_v36 = vpop.f32.mrf.mxu1 }
 0x14b   : > { %v937_v34 = vadd.f32 %v1298_v51, %v792_v54  ;;  %v1221_v33 = vadd.f32 %v1220_v36, %v1219_v39  ;;  %v682_v36 = vadd.f32 %v1159_v10, %v2269_v6 }
 0x14c   : > { %v1300_v62 = vpop.f32.mrf.mxu0  ;;  %v1222_v41 = vpop.f32.mrf.mxu1 }
 0x14d   : > { %983 = vst [vmem:[%s2276_s5 + $0x40] sm:$0xff] %v937_v34  ;;  %v797_v9 = vadd.f32 %v1221_v33, %v652_v63  ;;  %v1301_v4 = vadd.f32 %v1300_v62, %v1299_v16 }
 0x14e   : > { %v1302_v43 = vpop.f32.mrf.mxu0  ;;  %v1223_v19 = vpop.f32.mrf.mxu1 }
 0x14f   : > { %v942_v15 = vadd.f32 %v1301_v4, %v797_v9  ;;  %v1224_v29 = vadd.f32 %v1223_v19, %v1222_v41 }
 0x150   : > { %v1303_v28 = vpop.f32.mrf.mxu0  ;;  %v1225_v18 = vpop.f32.mrf.mxu1 }
 0x151   : > { %984 = vst [vmem:[%s2276_s5 + $0x48] sm:$0xff] %v942_v15  ;;  %v802_v0 = vadd.f32 %v1224_v29, %v657_v25  ;;  %v1304_v40 = vadd.f32 %v1303_v28, %v1302_v43 }
 0x152   : > { %v1305_v13 = vpop.f32.mrf.mxu0  ;;  %v1226_v44 = vpop.f32.mrf.mxu1 }
 0x153   : > { %v947_v21 = vadd.f32 %v1304_v40, %v802_v0  ;;  %v1227_v37 = vadd.f32 %v1226_v44, %v1225_v18 }
 0x154   : > { %v1306_v58 = vpop.f32.mrf.mxu0  ;;  %v1228_v23 = vpop.f32.mrf.mxu1 }
 0x155   : > { %985 = vst [vmem:[%s2276_s5 + $0x50] sm:$0xff] %v947_v21  ;;  %v807_v47 = vadd.f32 %v1227_v37, %v662_v53  ;;  %v1307_v24 = vadd.f32 %v1306_v58, %v1305_v13 }
 0x156   : > { %v1308_v57 = vpop.f32.mrf.mxu0  ;;  %v1229_v2 = vpop.f32.mrf.mxu1 }
 0x157   : > { %v952_v12 = vadd.f32 %v1307_v24, %v807_v47  ;;  %v1230_v59 = vadd.f32 %v1229_v2, %v1228_v23 }
 0x158   : > { %v1309_v32 = vpop.f32.mrf.mxu0  ;;  %v1231_v17 = vpop.f32.mrf.mxu1 }
 0x159   : > { %986 = vst [vmem:[%s2276_s5 + $0x58] sm:$0xff] %v952_v12  ;;  %v812_v27 = vadd.f32 %v1230_v59, %v667_v3  ;;  %v1310_v11 = vadd.f32 %v1309_v32, %v1308_v57 }
 0x15a   : > { %v1311_v35 = vpop.f32.mrf.mxu0  ;;  %v1232_v42 = vpop.f32.mrf.mxu1 }
 0x15b   : > { %v957_v1 = vadd.f32 %v1310_v11, %v812_v27  ;;  %v1233_v55 = vadd.f32 %v1232_v42, %v1231_v17 }
 0x15c   : > { %v1312_v8 = vpop.f32.mrf.mxu0  ;;  %v1234_v61 = vpop.f32.mrf.mxu1 }
 0x15d   : > { %987 = vst [vmem:[%s2276_s5 + $0x60] sm:$0xff] %v957_v1  ;;  %v817_v56 = vadd.f32 %v1233_v55, %v672_v50  ;;  %v1313_v38 = vadd.f32 %v1312_v8, %v1311_v35 }
 0x15e   : > { %v1314_v31 = vpop.f32.mrf.mxu0  ;;  %v1235_v20 = vpop.f32.mrf.mxu1 }
 0x15f   : > { %v962_v46 = vadd.f32 %v1313_v38, %v817_v56  ;;  %v1236_v30 = vadd.f32 %v1235_v20, %v1234_v61 }
 0x160   : > { %v1315_v52 = vpop.f32.mrf.mxu0  ;;  %v1237_v60 = vpop.f32.mrf.mxu1 }
 0x161   : > { %988 = vst [vmem:[%s2276_s5 + $0x68] sm:$0xff] %v962_v46  ;;  %v822_v39 = vadd.f32 %v1236_v30, %v677_v5  ;;  %v1316_v54 = vadd.f32 %v1315_v52, %v1314_v31 }
 0x162   : > { %v1317_v51 = vpop.f32.mrf.mxu0  ;;  %v1238_v16 = vpop.f32.mrf.mxu1 }
 0x163   : > { %v967_v63 = vadd.f32 %v1316_v54, %v822_v39  ;;  %v1239_v14 = vadd.f32 %v1238_v16, %v1237_v60 }
 0x164   : > { %v1318_v48 = vpop.f32.mrf.mxu0 }
 0x165   : > { %989 = vst [vmem:[%s2276_s5 + $0x70] sm:$0xff] %v967_v63  ;;  %v827_v49 = vadd.f32 %v1239_v14, %v682_v36  ;;  %v1319_v34 = vadd.f32 %v1318_v48, %v1317_v51 }
 0x167   : > { %v972_v6 = vadd.f32 %v1319_v34, %v827_v49 }
 0x169   : > { %990 = vst [vmem:[%s2276_s5 + $0x78] sm:$0xff] %v972_v6 }
 0x16a   : > { %1407 = shalt.err (!%p1404_p3)
}
 0x16b   : > { %s1408_s20 = scalar_lea.hbm %s2332_s10, 2048  ;;  %s1412_s26 = scalar_lea.hbm %s2382_s3, 8192 }
 0x16c   : > { %p1409_p4 = scmp.ne.s32.totalorder %s2332_s10, %s1408_s20  ;;  %p1413_p9 = scmp.lt.s32.totalorder %s2332_s10, %s2382_s3 }
 0x16d   : > { %p1414_p10 = scmp.lt.s32.totalorder %s1412_s26, %s1408_s20 }
 0x16e   : > { %p1410_p7 = pnand %p1409_p4, %p1517_p5 }
 0x16f   : > { %p1415_p11 = por %p1414_p10, %p1413_p9 }
 0x170   : > { %p1411_p8 = pneg %p1410_p7 }
 0x172   : > { %p1416_p12 = pnand %p1415_p11, %p1411_p8 }
 0x174   : > { %1419 = shalt.err (!%p1416_p12)
}
 0x175   : > { %s1457_s29 = smov 128   ;;  %s1458_s4 = smov 8  }
 0x176   : > { %1353 = dma.vmem_to_hbm [thread:$0]  (%p1517_p5), %s2334_s7, 2048, %s2332_s10, %s2339_s30, %s1457_s29, %s1457_s29, %s1458_s4  }
 0x177 PF: > { %p1359_p13 = scmp.ge.s32.totalorder %s1454_s15, 2  ;;  %s1020_s5 = sand.u32 1, %s1442_s12  }
 0x178   : > { %s1021_s6 = scalar_lea.sflag [#allocation3], %s1020_s5 }
 0x179   : > { %p1356_p0 = pnand %p1359_p13, %p1521_p6 }
 0x17b   : > { %p1357_p1 = pneg %p1356_p0 }
 0x17d   : > { %1437 = dma.done.wait (%p1357_p1), %s1021_s6, 2048  }
 0x17e   : > { %1439 = vsyncadd (%p1357_p1), %s1021_s6, 4294965248  ;;  %p13_p2 = scmp.ge.s32.totalorder %s1504_s18, 6   ;;  %s2389_s12 = smov %s1446_s13 }
 0x17f   : > { %s2390_s13 = smov %s1450_s14  ;;  %s2391_s14 = smov %s1515_s21 }
 0x180   : > { %s2392_s15 = smov %s1504_s18  ;;  %15 = sbr.rel (!%p13_p2) target bundleno = 3 (0x3), region = 67 }
 0x185   :  { %1026 = vsyncpa [#allocation3], 1 }
 0x186   :  { %1028 = vsyncpa [#allocation3 + $0x1], 1 }

</bundles_post_ra>
